<compile_context>
chip_gen: v7x
topology: tpu7x:2x2x1
jax: 0.10.0
libtpu: 0.0.40
codegen_flags: <defaults>
</compile_context>

<pallas_src>
import jax
import jax.numpy as jnp
from jax.experimental import pallas as pl
from jax.experimental.pallas import tpu as pltpu


LEAKY_SLOPE = 0.01          # F.leaky_relu default negative_slope
BN_EPS = 1e-5               # nn.BatchNorm1d default eps
ANGULAR_BOUND = 1.5
LINEAR_BOUND = 0.5
WIDTH = 128                 # padded lane width for every hidden layer
N_BN_LAYERS = 4

# params slab row layout ([P_ROWS, 128] float32)
_GAMMA0 = 0                 # rows 0..3 : BN gamma, layers 1..4 (padding lanes = 0)
_BETA0 = 4                  # rows 4..7 : BN beta,  layers 1..4
_W_ANG = 8                  # row 8     : mu_angular weight (lanes 0..63)
_W_LIN = 9                  # row 9     : mu_linear  weight (lanes 0..63)
_B_HEAD = 10                # row 10    : head biases (lane 0 = angular, lane 1 = linear)
P_ROWS = 11


def _round_up(n, m):
    return ((n + m - 1) // m) * m


def _softplus(x):
    # torch softplus: beta=1, threshold=20 (exactly linear above the threshold)
    safe = jnp.minimum(x, 20.0)
    return jnp.where(x > 20.0, x, jnp.log1p(jnp.exp(safe)))


def actor_kernel(x_ref, w_ref, p_ref, out_ref):
    h = x_ref[...].astype(jnp.float32)                     # [B, K_pad] f32
    B, k_pad = h.shape
    inv_b = 1.0 / B                                        # true batch size (no padding)

    p = p_ref[...]                                         # [P_ROWS, 128] f32

    # fc -> BatchNorm1d(batch stats) -> leaky_relu, x4.  bf16 MXU operands,
    # f32 accumulation + f32 BN statistics.
    row = 0
    for i in range(N_BN_LAYERS):
        k = k_pad if i == 0 else WIDTH
        w = w_ref[row:row + k, :]                          # bf16 [k, 128], static slice
        row += k
        y = jnp.dot(h.astype(jnp.bfloat16), w,
                    preferred_element_type=jnp.float32)    # [B, 128] f32
        mean = jnp.sum(y, axis=0, keepdims=True) * inv_b   # [1, 128]
        d = y - mean
        var = jnp.sum(d * d, axis=0, keepdims=True) * inv_b        # biased, centered
        scale = p[_GAMMA0 + i:_GAMMA0 + i + 1, :] * jax.lax.rsqrt(var + BN_EPS)
        y_hat = d * scale + p[_BETA0 + i:_BETA0 + i + 1, :]
        h = jnp.maximum(y_hat, LEAKY_SLOPE * y_hat)        # leaky_relu

    # Heads on VPU/XLU: two 64-wide dot products (padded lanes of h are 0).
    ya = jnp.sum(h * p[_W_ANG:_W_ANG + 1, :], axis=-1, keepdims=True)   # [B, 1]
    yl = jnp.sum(h * p[_W_LIN:_W_LIN + 1, :], axis=-1, keepdims=True)   # [B, 1]

    col = jax.lax.broadcasted_iota(jnp.int32, (B, WIDTH), 1)
    is_ang = col == 0
    is_lin = col == 1
    y_head = (jnp.where(is_ang, ya, 0.0)
              + jnp.where(is_lin, yl, 0.0)
              + p[_B_HEAD:_B_HEAD + 1, :])
    out = jnp.where(is_ang,
                    jnp.tanh(y_head) * ANGULAR_BOUND,
                    _softplus(y_head) * LINEAR_BOUND)
    # Lane-dense store; lanes >= 2 are don't-care and sliced off in the wrapper.
    out_ref[...] = out.astype(out_ref.dtype)


def actor_forward(state, packed_params):
    """state: [B, state_size] float32. Returns action [B, 2] float32."""
    w_slab, p_slab = packed_params
    B, S = state.shape
    k_pad = w_slab.shape[0] - 3 * WIDTH                    # layer-1 padded input width
    assert S <= k_pad, "state_size exceeds packed layer-1 width"

    x = state.astype(jnp.float32)
    if S < k_pad:                                          # tiny pad (<=16 lanes), not 128
        x = jnp.pad(x, ((0, 0), (0, k_pad - S)))

    vmem = pl.BlockSpec(memory_space=pltpu.MemorySpace.VMEM)

    matmul_flops = 2 * B * WIDTH * (k_pad + 3 * WIDTH)
    vpu_flops = 16 * B * WIDTH                             # BN / activations / heads (approx)
    cost = pl.CostEstimate(
        flops=matmul_flops + vpu_flops,
        transcendentals=2 * B * WIDTH + N_BN_LAYERS * WIDTH,
        bytes_accessed=(x.size * 4 + w_slab.size * 2 + p_slab.size * 4
                        + B * WIDTH * 4),
    )

    out = pl.pallas_call(
        actor_kernel,
        out_shape=jax.ShapeDtypeStruct((B, WIDTH), jnp.float32),
        in_specs=[vmem, vmem, vmem],
        out_specs=vmem,
        cost_estimate=cost,
    )(x, w_slab, p_slab)
    return out[:, :2]                                      # wrapper slice is ~free


def init_params(key, state_size):
    """Packed parameter slabs mirroring the PyTorch module's init.

    fc weights: kaiming_normal_ (fan_in, gain=sqrt(2)); head weights:
    xavier_normal_; head biases: PyTorch Linear default U(-1/sqrt(fan_in), .);
    BN gamma=1 (real features) / 0 (padding), beta=0.  fc1..fc4 biases dropped
    (exactly cancelled by training-mode BatchNorm).  Weight slab stored bf16.
    """
    keys = jax.random.split(key, 8)
    k_pad = max(16, _round_up(state_size, 16))             # bf16 sublane-tile aligned

    def kaiming(k, fan_in, fan_out):
        std = jnp.sqrt(2.0 / fan_in)
        return (jax.random.normal(k, (fan_out, fan_in), jnp.float32) * std).T

    def xavier(k, fan_in, fan_out):
        std = jnp.sqrt(2.0 / (fan_in + fan_out))
        return (jax.random.normal(k, (fan_out, fan_in), jnp.float32) * std).T

    def lin_bias(k, fan_in):
        bound = 1.0 / jnp.sqrt(fan_in)
        return jax.random.uniform(k, (1,), jnp.float32, minval=-bound, maxval=bound)

    w_slab = jnp.zeros((k_pad + 3 * WIDTH, WIDTH), jnp.float32)
    p_slab = jnp.zeros((P_ROWS, WIDTH), jnp.float32)

    dims = [(state_size, 128), (128, 128), (128, 64), (64, 64)]
    row_offs = [0, k_pad, k_pad + WIDTH, k_pad + 2 * WIDTH]
    for i, ((din, dout), off) in enumerate(zip(dims, row_offs)):
        w = kaiming(keys[i], din, dout)                    # [din, dout]
        w_slab = w_slab.at[off:off + din, :dout].set(w)    # padded rows/cols stay 0
        p_slab = p_slab.at[_GAMMA0 + i, :dout].set(1.0)    # padded lanes gamma = 0
        # beta stays 0 (BatchNorm default); fc bias dropped (BN-cancelled).

    wa = xavier(keys[4], 64, 1)                            # [64, 1]
    wl = xavier(keys[5], 64, 1)
    ba = lin_bias(keys[6], 64)
    bl = lin_bias(keys[7], 64)
    p_slab = p_slab.at[_W_ANG, :64].set(wa[:, 0])
    p_slab = p_slab.at[_W_LIN, :64].set(wl[:, 0])
    p_slab = p_slab.at[_B_HEAD, 0].set(ba[0])
    p_slab = p_slab.at[_B_HEAD, 1].set(bl[0])

    return (w_slab.astype(jnp.bfloat16), p_slab)


if __name__ == "__main__":
    key = jax.random.PRNGKey(0)
    k_state, k_params = jax.random.split(key)

    batch = 8
    state_size = 16  # small synthetic state dimension

    state = jax.random.normal(k_state, (batch, state_size), jnp.float32)
    params = init_params(k_params, state_size)

    action = actor_forward(state, params)
    action = jax.block_until_ready(action)

    assert action.shape == (batch, 2), action.shape
    assert action.dtype == jnp.float32
    assert bool(jnp.all(jnp.isfinite(action)))
    print("KERNEL_OK")
</pallas_src>

<mosaic_0001>
module attributes {stable_mosaic.version = 11 : i64} {
  func.func @actor_kernel(%arg0: memref<8x16xf32, #tpu.memory_space<vmem>>, %arg1: memref<400x128xbf16, #tpu.memory_space<vmem>>, %arg2: memref<11x128xf32, #tpu.memory_space<vmem>>, %arg3: memref<8x128xf32, #tpu.memory_space<vmem>>) attributes {dimension_semantics = [], scalar_prefetch = 0 : i64, scratch_operands = 0 : i64, tpu.core_type = #tpu.core_type<tc>} {
    %c0 = arith.constant 0 : index
    %c0_0 = arith.constant 0 : index
    %0 = vector.load %arg0[%c0, %c0_0] : memref<8x16xf32, #tpu.memory_space<vmem>>, vector<8x16xf32>
    %c0_1 = arith.constant 0 : index
    %c0_2 = arith.constant 0 : index
    %1 = vector.load %arg2[%c0_1, %c0_2] : memref<11x128xf32, #tpu.memory_space<vmem>>, vector<11x128xf32>
    %c0_3 = arith.constant 0 : index
    %c0_4 = arith.constant 0 : index
    %2 = vector.load %arg1[%c0_3, %c0_4] : memref<400x128xbf16, #tpu.memory_space<vmem>>, vector<16x128xbf16>
    %3 = arith.truncf %0 : vector<8x16xf32> to vector<8x16xbf16>
    %cst = arith.constant dense<0.000000e+00> : vector<8x128xf32>
    %4 = tpu.matmul %3, %2, %cst {dimension_numbers = #tpu.dot_dimension_numbers<[1], [0], [0], [1], [0, 0, 1, 1], [], []>} : vector<8x16xbf16>, vector<16x128xbf16>, vector<8x128xf32> -> vector<8x128xf32>
    %cst_5 = arith.constant dense<0.000000e+00> : vector<128xf32>
    %5 = vector.multi_reduction <add>, %4, %cst_5 [0] : vector<8x128xf32> to vector<128xf32>
    %6 = vector.shape_cast %5 : vector<128xf32> to vector<1x128xf32>
    %cst_6 = arith.constant 1.250000e-01 : f32
    %7 = vector.broadcast %cst_6 : f32 to vector<1x128xf32>
    %8 = arith.mulf %6, %7 : vector<1x128xf32>
    %9 = vector.broadcast %8 : vector<1x128xf32> to vector<8x128xf32>
    %10 = arith.subf %4, %9 : vector<8x128xf32>
    %11 = arith.mulf %10, %10 : vector<8x128xf32>
    %cst_7 = arith.constant dense<0.000000e+00> : vector<128xf32>
    %12 = vector.multi_reduction <add>, %11, %cst_7 [0] : vector<8x128xf32> to vector<128xf32>
    %13 = vector.shape_cast %12 : vector<128xf32> to vector<1x128xf32>
    %cst_8 = arith.constant 1.250000e-01 : f32
    %14 = vector.broadcast %cst_8 : f32 to vector<1x128xf32>
    %15 = arith.mulf %13, %14 : vector<1x128xf32>
    %16 = vector.extract_strided_slice %1 {offsets = [0, 0], sizes = [1, 128], strides = [1, 1]} : vector<11x128xf32> to vector<1x128xf32>
    %cst_9 = arith.constant 9.99999974E-6 : f32
    %17 = vector.broadcast %cst_9 : f32 to vector<1x128xf32>
    %18 = arith.addf %15, %17 : vector<1x128xf32>
    %19 = math.rsqrt %18 : vector<1x128xf32>
    %20 = arith.mulf %16, %19 : vector<1x128xf32>
    %21 = vector.broadcast %20 : vector<1x128xf32> to vector<8x128xf32>
    %22 = arith.mulf %10, %21 : vector<8x128xf32>
    %23 = vector.extract_strided_slice %1 {offsets = [4, 0], sizes = [1, 128], strides = [1, 1]} : vector<11x128xf32> to vector<1x128xf32>
    %24 = vector.broadcast %23 : vector<1x128xf32> to vector<8x128xf32>
    %25 = arith.addf %22, %24 : vector<8x128xf32>
    %cst_10 = arith.constant 0.00999999977 : f32
    %26 = vector.broadcast %cst_10 : f32 to vector<8x128xf32>
    %27 = arith.mulf %26, %25 : vector<8x128xf32>
    %28 = arith.maximumf %25, %27 : vector<8x128xf32>
    %c16 = arith.constant 16 : index
    %c0_11 = arith.constant 0 : index
    %29 = vector.load %arg1[%c16, %c0_11] : memref<400x128xbf16, #tpu.memory_space<vmem>>, vector<128x128xbf16>
    %30 = arith.truncf %28 : vector<8x128xf32> to vector<8x128xbf16>
    %cst_12 = arith.constant dense<0.000000e+00> : vector<8x128xf32>
    %31 = tpu.matmul %30, %29, %cst_12 {dimension_numbers = #tpu.dot_dimension_numbers<[1], [0], [0], [1], [0, 0, 1, 1], [], []>} : vector<8x128xbf16>, vector<128x128xbf16>, vector<8x128xf32> -> vector<8x128xf32>
    %cst_13 = arith.constant dense<0.000000e+00> : vector<128xf32>
    %32 = vector.multi_reduction <add>, %31, %cst_13 [0] : vector<8x128xf32> to vector<128xf32>
    %33 = vector.shape_cast %32 : vector<128xf32> to vector<1x128xf32>
    %cst_14 = arith.constant 1.250000e-01 : f32
    %34 = vector.broadcast %cst_14 : f32 to vector<1x128xf32>
    %35 = arith.mulf %33, %34 : vector<1x128xf32>
    %36 = vector.broadcast %35 : vector<1x128xf32> to vector<8x128xf32>
    %37 = arith.subf %31, %36 : vector<8x128xf32>
    %38 = arith.mulf %37, %37 : vector<8x128xf32>
    %cst_15 = arith.constant dense<0.000000e+00> : vector<128xf32>
    %39 = vector.multi_reduction <add>, %38, %cst_15 [0] : vector<8x128xf32> to vector<128xf32>
    %40 = vector.shape_cast %39 : vector<128xf32> to vector<1x128xf32>
    %cst_16 = arith.constant 1.250000e-01 : f32
    %41 = vector.broadcast %cst_16 : f32 to vector<1x128xf32>
    %42 = arith.mulf %40, %41 : vector<1x128xf32>
    %43 = vector.extract_strided_slice %1 {offsets = [1, 0], sizes = [1, 128], strides = [1, 1]} : vector<11x128xf32> to vector<1x128xf32>
    %cst_17 = arith.constant 9.99999974E-6 : f32
    %44 = vector.broadcast %cst_17 : f32 to vector<1x128xf32>
    %45 = arith.addf %42, %44 : vector<1x128xf32>
    %46 = math.rsqrt %45 : vector<1x128xf32>
    %47 = arith.mulf %43, %46 : vector<1x128xf32>
    %48 = vector.broadcast %47 : vector<1x128xf32> to vector<8x128xf32>
    %49 = arith.mulf %37, %48 : vector<8x128xf32>
    %50 = vector.extract_strided_slice %1 {offsets = [5, 0], sizes = [1, 128], strides = [1, 1]} : vector<11x128xf32> to vector<1x128xf32>
    %51 = vector.broadcast %50 : vector<1x128xf32> to vector<8x128xf32>
    %52 = arith.addf %49, %51 : vector<8x128xf32>
    %cst_18 = arith.constant 0.00999999977 : f32
    %53 = vector.broadcast %cst_18 : f32 to vector<8x128xf32>
    %54 = arith.mulf %53, %52 : vector<8x128xf32>
    %55 = arith.maximumf %52, %54 : vector<8x128xf32>
    %c144 = arith.constant 144 : index
    %c0_19 = arith.constant 0 : index
    %56 = vector.load %arg1[%c144, %c0_19] : memref<400x128xbf16, #tpu.memory_space<vmem>>, vector<128x128xbf16>
    %57 = arith.truncf %55 : vector<8x128xf32> to vector<8x128xbf16>
    %cst_20 = arith.constant dense<0.000000e+00> : vector<8x128xf32>
    %58 = tpu.matmul %57, %56, %cst_20 {dimension_numbers = #tpu.dot_dimension_numbers<[1], [0], [0], [1], [0, 0, 1, 1], [], []>} : vector<8x128xbf16>, vector<128x128xbf16>, vector<8x128xf32> -> vector<8x128xf32>
    %cst_21 = arith.constant dense<0.000000e+00> : vector<128xf32>
    %59 = vector.multi_reduction <add>, %58, %cst_21 [0] : vector<8x128xf32> to vector<128xf32>
    %60 = vector.shape_cast %59 : vector<128xf32> to vector<1x128xf32>
    %cst_22 = arith.constant 1.250000e-01 : f32
    %61 = vector.broadcast %cst_22 : f32 to vector<1x128xf32>
    %62 = arith.mulf %60, %61 : vector<1x128xf32>
    %63 = vector.broadcast %62 : vector<1x128xf32> to vector<8x128xf32>
    %64 = arith.subf %58, %63 : vector<8x128xf32>
    %65 = arith.mulf %64, %64 : vector<8x128xf32>
    %cst_23 = arith.constant dense<0.000000e+00> : vector<128xf32>
    %66 = vector.multi_reduction <add>, %65, %cst_23 [0] : vector<8x128xf32> to vector<128xf32>
    %67 = vector.shape_cast %66 : vector<128xf32> to vector<1x128xf32>
    %cst_24 = arith.constant 1.250000e-01 : f32
    %68 = vector.broadcast %cst_24 : f32 to vector<1x128xf32>
    %69 = arith.mulf %67, %68 : vector<1x128xf32>
    %70 = vector.extract_strided_slice %1 {offsets = [2, 0], sizes = [1, 128], strides = [1, 1]} : vector<11x128xf32> to vector<1x128xf32>
    %cst_25 = arith.constant 9.99999974E-6 : f32
    %71 = vector.broadcast %cst_25 : f32 to vector<1x128xf32>
    %72 = arith.addf %69, %71 : vector<1x128xf32>
    %73 = math.rsqrt %72 : vector<1x128xf32>
    %74 = arith.mulf %70, %73 : vector<1x128xf32>
    %75 = vector.broadcast %74 : vector<1x128xf32> to vector<8x128xf32>
    %76 = arith.mulf %64, %75 : vector<8x128xf32>
    %77 = vector.extract_strided_slice %1 {offsets = [6, 0], sizes = [1, 128], strides = [1, 1]} : vector<11x128xf32> to vector<1x128xf32>
    %78 = vector.broadcast %77 : vector<1x128xf32> to vector<8x128xf32>
    %79 = arith.addf %76, %78 : vector<8x128xf32>
    %cst_26 = arith.constant 0.00999999977 : f32
    %80 = vector.broadcast %cst_26 : f32 to vector<8x128xf32>
    %81 = arith.mulf %80, %79 : vector<8x128xf32>
    %82 = arith.maximumf %79, %81 : vector<8x128xf32>
    %c272 = arith.constant 272 : index
    %c0_27 = arith.constant 0 : index
    %83 = vector.load %arg1[%c272, %c0_27] : memref<400x128xbf16, #tpu.memory_space<vmem>>, vector<128x128xbf16>
    %84 = arith.truncf %82 : vector<8x128xf32> to vector<8x128xbf16>
    %cst_28 = arith.constant dense<0.000000e+00> : vector<8x128xf32>
    %85 = tpu.matmul %84, %83, %cst_28 {dimension_numbers = #tpu.dot_dimension_numbers<[1], [0], [0], [1], [0, 0, 1, 1], [], []>} : vector<8x128xbf16>, vector<128x128xbf16>, vector<8x128xf32> -> vector<8x128xf32>
    %cst_29 = arith.constant dense<0.000000e+00> : vector<128xf32>
    %86 = vector.multi_reduction <add>, %85, %cst_29 [0] : vector<8x128xf32> to vector<128xf32>
    %87 = vector.shape_cast %86 : vector<128xf32> to vector<1x128xf32>
    %cst_30 = arith.constant 1.250000e-01 : f32
    %88 = vector.broadcast %cst_30 : f32 to vector<1x128xf32>
    %89 = arith.mulf %87, %88 : vector<1x128xf32>
    %90 = vector.broadcast %89 : vector<1x128xf32> to vector<8x128xf32>
    %91 = arith.subf %85, %90 : vector<8x128xf32>
    %92 = arith.mulf %91, %91 : vector<8x128xf32>
    %cst_31 = arith.constant dense<0.000000e+00> : vector<128xf32>
    %93 = vector.multi_reduction <add>, %92, %cst_31 [0] : vector<8x128xf32> to vector<128xf32>
    %94 = vector.shape_cast %93 : vector<128xf32> to vector<1x128xf32>
    %cst_32 = arith.constant 1.250000e-01 : f32
    %95 = vector.broadcast %cst_32 : f32 to vector<1x128xf32>
    %96 = arith.mulf %94, %95 : vector<1x128xf32>
    %97 = vector.extract_strided_slice %1 {offsets = [3, 0], sizes = [1, 128], strides = [1, 1]} : vector<11x128xf32> to vector<1x128xf32>
    %cst_33 = arith.constant 9.99999974E-6 : f32
    %98 = vector.broadcast %cst_33 : f32 to vector<1x128xf32>
    %99 = arith.addf %96, %98 : vector<1x128xf32>
    %100 = math.rsqrt %99 : vector<1x128xf32>
    %101 = arith.mulf %97, %100 : vector<1x128xf32>
    %102 = vector.broadcast %101 : vector<1x128xf32> to vector<8x128xf32>
    %103 = arith.mulf %91, %102 : vector<8x128xf32>
    %104 = vector.extract_strided_slice %1 {offsets = [7, 0], sizes = [1, 128], strides = [1, 1]} : vector<11x128xf32> to vector<1x128xf32>
    %105 = vector.broadcast %104 : vector<1x128xf32> to vector<8x128xf32>
    %106 = arith.addf %103, %105 : vector<8x128xf32>
    %cst_34 = arith.constant 0.00999999977 : f32
    %107 = vector.broadcast %cst_34 : f32 to vector<8x128xf32>
    %108 = arith.mulf %107, %106 : vector<8x128xf32>
    %109 = arith.maximumf %106, %108 : vector<8x128xf32>
    %110 = vector.extract_strided_slice %1 {offsets = [8, 0], sizes = [1, 128], strides = [1, 1]} : vector<11x128xf32> to vector<1x128xf32>
    %111 = vector.broadcast %110 : vector<1x128xf32> to vector<8x128xf32>
    %112 = arith.mulf %109, %111 : vector<8x128xf32>
    %cst_35 = arith.constant dense<0.000000e+00> : vector<8xf32>
    %113 = vector.multi_reduction <add>, %112, %cst_35 [1] : vector<8x128xf32> to vector<8xf32>
    %114 = vector.shape_cast %113 : vector<8xf32> to vector<8x1xf32>
    %115 = vector.extract_strided_slice %1 {offsets = [9, 0], sizes = [1, 128], strides = [1, 1]} : vector<11x128xf32> to vector<1x128xf32>
    %116 = vector.broadcast %115 : vector<1x128xf32> to vector<8x128xf32>
    %117 = arith.mulf %109, %116 : vector<8x128xf32>
    %cst_36 = arith.constant dense<0.000000e+00> : vector<8xf32>
    %118 = vector.multi_reduction <add>, %117, %cst_36 [1] : vector<8x128xf32> to vector<8xf32>
    %119 = vector.shape_cast %118 : vector<8xf32> to vector<8x1xf32>
    %120 = tpu.iota {dimensions = array<i32: 1>} : vector<8x128xi32>
    %c0_i32 = arith.constant 0 : i32
    %121 = vector.broadcast %c0_i32 : i32 to vector<8x128xi32>
    %122 = arith.cmpi eq, %120, %121 : vector<8x128xi32>
    %c1_i32 = arith.constant 1 : i32
    %123 = vector.broadcast %c1_i32 : i32 to vector<8x128xi32>
    %124 = arith.cmpi eq, %120, %123 : vector<8x128xi32>
    %cst_37 = arith.constant 0.000000e+00 : f32
    %125 = vector.shape_cast %114 : vector<8x1xf32> to vector<8x1xf32>
    %126 = vector.broadcast %125 : vector<8x1xf32> to vector<8x128xf32>
    %127 = vector.broadcast %cst_37 : f32 to vector<8x128xf32>
    %128 = arith.select %122, %126, %127 : vector<8x128xi1>, vector<8x128xf32>
    %cst_38 = arith.constant 0.000000e+00 : f32
    %129 = vector.shape_cast %119 : vector<8x1xf32> to vector<8x1xf32>
    %130 = vector.broadcast %129 : vector<8x1xf32> to vector<8x128xf32>
    %131 = vector.broadcast %cst_38 : f32 to vector<8x128xf32>
    %132 = arith.select %124, %130, %131 : vector<8x128xi1>, vector<8x128xf32>
    %133 = arith.addf %128, %132 : vector<8x128xf32>
    %134 = vector.extract_strided_slice %1 {offsets = [10, 0], sizes = [1, 128], strides = [1, 1]} : vector<11x128xf32> to vector<1x128xf32>
    %135 = vector.broadcast %134 : vector<1x128xf32> to vector<8x128xf32>
    %136 = arith.addf %133, %135 : vector<8x128xf32>
    %137 = math.tanh %136 : vector<8x128xf32>
    %cst_39 = arith.constant 1.500000e+00 : f32
    %138 = vector.broadcast %cst_39 : f32 to vector<8x128xf32>
    %139 = arith.mulf %137, %138 : vector<8x128xf32>
    %cst_40 = arith.constant 2.000000e+01 : f32
    %140 = vector.broadcast %cst_40 : f32 to vector<8x128xf32>
    %141 = arith.minimumf %136, %140 : vector<8x128xf32>
    %cst_41 = arith.constant 2.000000e+01 : f32
    %142 = vector.broadcast %cst_41 : f32 to vector<8x128xf32>
    %143 = arith.cmpf ogt, %136, %142 : vector<8x128xf32>
    %144 = math.exp %141 : vector<8x128xf32>
    %145 = math.log1p %144 : vector<8x128xf32>
    %146 = arith.select %143, %136, %145 : vector<8x128xi1>, vector<8x128xf32>
    %cst_42 = arith.constant 5.000000e-01 : f32
    %147 = vector.broadcast %cst_42 : f32 to vector<8x128xf32>
    %148 = arith.mulf %146, %147 : vector<8x128xf32>
    %149 = arith.select %122, %139, %148 : vector<8x128xi1>, vector<8x128xf32>
    %c0_43 = arith.constant 0 : index
    %c0_44 = arith.constant 0 : index
    %150 = vector.load %arg3[%c0_43, %c0_44] : memref<8x128xf32, #tpu.memory_space<vmem>>, vector<8x128xf32>
    tpu.vector_store %arg3[%c0_43, %c0_44], %149 {strides = array<i32>} : memref<8x128xf32, #tpu.memory_space<vmem>>, vector<8x128xf32>,
    return
  }
}

</mosaic_0001>

<bundles_post_ra>
// kernel: tpu_custom_call.1
= control target key start
LH: loop header
LB: loop body
LE: loop exit
PB: predicated region body
PF: predicated region fallthrough
CT: control target
= control target key end

     0   :  { %8 = vsyncpa [#allocation3], 0  ;;  %s1018_s0 = inlined_call_operand.hbm [shape: f32[8,16], index: 0, kind: input, shape index: {}]   ;;  %s1019_s1 = inlined_call_operand.hbm [shape: bf16[400,128], index: 1, kind: input, shape index: {}]   ;;  %s1020_s2 = inlined_call_operand.hbm [shape: f32[11,128], index: 2, kind: input, shape index: {}]   ;;  %s1021_s3 = inlined_call_operand.hbm [shape: f32[8,128], index: 3, kind: output, shape index: {}]  }
   0x1   :  { %9 = vsyncpa [#allocation6], 0 }
   0x2   :  { %10 = vsyncpa [#allocation4], 0  ;;  %s875_s12 = smov [#allocation5]   ;;  %s781_s16 = scalar_lea.hbm %s1019_s1, 3200 }
   0x3   :  { %s26_s13 = sshll.u32 %s875_s12, 4  ;;  %p782_p0 = scmp.ne.s32.totalorder %s1019_s1, %s781_s16  ;;  %s27_s13 = int_to_ptr.vmem [resolvable:$true] %s26_s13 }
   0x4   :  { %p785_p1 = scmp.lt.u32.totalorder %s781_s16, %s1019_s1 }
   0x6   :  { %p787_p2 = pnand %p785_p1, %p782_p0 }
   0x8   :  { %790 = shalt.err (!%p787_p2)
}
   0x9   :  { %s791_s21 = scalar_lea.vmem %s27_s13, 3200  ;;  %p796_p4 = scmp.lt.s32.totalorder %s27_s13, %s27_s13 }
   0xa   :  { %p792_p3 = scmp.ne.s32.totalorder %s27_s13, %s791_s21  ;;  %p797_p5 = scmp.lt.s32.totalorder %s791_s21, %s791_s21 }
   0xc   :  { %p798_p6 = por %p797_p5, %p796_p4 }
   0xe   :  { %p799_p7 = pnand %p798_p6, %p792_p3 }
  0x10   :  { %802 = shalt.err (!%p799_p7)
}
  0x11   :  { %s876_s22 = smov 64   ;;  %s877_s23 = smov 4  }
  0x12   :  { %32 = dma.hbm_to_vmem [thread:$0]  %s1019_s1, 3200, %s27_s13, [#allocation6], %s876_s22, %s876_s22, %s877_s23  }
  0x13   :  { %s878_s26 = smov [#allocation2]   ;;  %s879_s28 = smov [#allocation7]  }
  0x14   :  { %s17_s27 = sshll.u32 %s878_s26, 4  ;;  %s38_s29 = sshll.u32 %s879_s28, 4  ;;  %s18_s27 = int_to_ptr.vmem [resolvable:$true] %s17_s27  ;;  %s39_s29 = int_to_ptr.vmem [resolvable:$true] %s38_s29 }
  0x15   :  { %s803_s5 = scalar_lea.hbm %s1018_s0, 128 }
  0x16   :  { %p804_p8 = scmp.ne.s32.totalorder %s1018_s0, %s803_s5  ;;  %p807_p9 = scmp.lt.u32.totalorder %s803_s5, %s1018_s0 }
  0x18   :  { %p809_p10 = pnand %p807_p9, %p804_p8 }
  0x1a   :  { %812 = shalt.err (!%p809_p10)
}
  0x1b   :  { %s813_s1 = scalar_lea.vmem %s18_s27, 128  ;;  %p818_p12 = scmp.lt.s32.totalorder %s18_s27, %s18_s27 }
  0x1c   :  { %p814_p11 = scmp.ne.s32.totalorder %s18_s27, %s813_s1  ;;  %p819_p13 = scmp.lt.s32.totalorder %s813_s1, %s813_s1 }
  0x1e   :  { %p820_p0 = por %p819_p13, %p818_p12 }
  0x20   :  { %p821_p1 = pnand %p820_p0, %p814_p11 }
  0x22   :  { %824 = shalt.err (!%p821_p1)
}
  0x23   :  { %20 = dma.hbm_to_vmem [thread:$0]  %s1018_s0, 128, %s18_s27, [#allocation3]  }
  0x24   :  { %s825_s14 = scalar_lea.hbm %s1020_s2, 256 }
  0x25   :  { %p826_p2 = scmp.ne.s32.totalorder %s1020_s2, %s825_s14  ;;  %p829_p3 = scmp.lt.u32.totalorder %s825_s14, %s1020_s2 }
  0x27   :  { %p831_p4 = pnand %p829_p3, %p826_p2 }
  0x29   :  { %834 = shalt.err (!%p831_p4)
}
  0x2a   :  { %s835_s19 = scalar_lea.vmem %s39_s29, 256  ;;  %p840_p6 = scmp.lt.s32.totalorder %s39_s29, %s39_s29 }
  0x2b   :  { %p836_p5 = scmp.ne.s32.totalorder %s39_s29, %s835_s19  ;;  %p841_p7 = scmp.lt.s32.totalorder %s835_s19, %s835_s19 }
  0x2d   :  { %p842_p8 = por %p841_p7, %p840_p6 }
  0x2f   :  { %p843_p9 = pnand %p842_p8, %p836_p5 }
  0x31   :  { %846 = shalt.err (!%p843_p9)
}
  0x32   :  { %s880_s0 = smov 128   ;;  %s881_s20 = smov 8  }
  0x33   :  { %44 = dma.hbm_to_vmem [thread:$0]  %s1020_s2, 256, %s39_s29, [#allocation6], %s880_s0, %s880_s0, %s881_s20  }
  0x34   :  { %869 = dma.done.wait [#allocation3], 128  }
  0x35   :  { %870 = vsyncadd [#allocation3], 4294967168 }
  0x36   :  { %871 = dma.done.wait [#allocation6], 3456  }
  0x37   :  { %872 = vsyncadd [#allocation6], 4294963840  ;;  %v882_v0 = vmov 0.0   ;;  %vm883_vm0 = vmmov 0   ;;  %v742_v1 = vld [vmem:[#allocation5] sm:$0xff]   ;;  %v55_v2 = vld [vmem:[#allocation2] sm:$0xff]  ;;  %v130_v33 = vlaneseq }
  0x38   :  { %666 = vmatprep.subr.bf16.mxu0 %v882_v0  ;;  %668 = vmatprep.mubr.msk.bf16.mxu0 %vm883_vm0, %v882_v0  ;;  %vm67_vm1 = vcmask 130048   ;;  %v60_v3 = vpack.c.bf16 %v55_v2, %v55_v2  ;;  %v743_v4 = vld [vmem:[#allocation5 + $0x8] sm:$0xff]   ;;  %v744_v5 = vld [vmem:[#allocation5 + $0x10] sm:$0xff]   ;;  %v745_v6 = vld [vmem:[#allocation5 + $0x18] sm:$0xff]   ;;  %s884_s2 = smov [#allocation8]  }
  0x39   :  { %672 = vmatprep.subr.bf16.mxu1 %v882_v0  ;;  %688 = vmatprep.mubr.msk.bf16.mxu1 %vm883_vm0, %v882_v0  ;;  %v746_v7 = vld [vmem:[#allocation5 + $0x20] sm:$0xff]   ;;  %v747_v8 = vld [vmem:[#allocation5 + $0x28] sm:$0xff]   ;;  %v748_v9 = vld [vmem:[#allocation5 + $0x30] sm:$0xff]   ;;  %v959_v34 = vshrl.u32 %v130_v33, 7  ;;  %s601_s23 = sshll.u32 %s884_s2, 4  ;;  %s602_s23 = int_to_ptr.vmem [resolvable:$true] %s601_s23 }
  0x3a   :  { %667 = vmatpush3.bf16.msra.mxu0 %v742_v1  ;;  %673 = vmatpush3.bf16.msra.mxu1 %v743_v4  ;;  %v749_v10 = vld [vmem:[#allocation5 + $0x38] sm:$0xff]   ;;  %v750_v11 = vld [vmem:[#allocation5 + $0x40] sm:$0xff]   ;;  %v961_v35 = vld [vmem:[#allocation7] sm:$0xff]  ;;  %s847_s24 = scalar_lea.vmem %s602_s23, 128  ;;  %p852_p11 = scmp.lt.s32.totalorder %s602_s23, %s602_s23 }
  0x3b   :  { %692 = vmatprep.subr.bf16.mxu0 %v882_v0  ;;  %674 = vmatprep.subr.bf16.mxu1 %v882_v0  ;;  %v132_v36 = vsub.s32 0, %v959_v34  ;;  %v137_v37 = vsub.s32 4, %v959_v34  ;;  %v751_v47 = vld [vmem:[#allocation5 + $0x48] sm:$0xff]   ;;  %v752_v48 = vld [vmem:[#allocation5 + $0x50] sm:$0xff]   ;;  %v753_v49 = vld [vmem:[#allocation5 + $0x58] sm:$0xff]   ;;  %p848_p10 = scmp.ne.s32.totalorder %s602_s23, %s847_s24  ;;  %p853_p12 = scmp.lt.s32.totalorder %s847_s24, %s847_s24 }
  0x3c   :  { %v754_v50 = vld [vmem:[#allocation5 + $0x60] sm:$0xff]   ;;  %v755_v51 = vld [vmem:[#allocation5 + $0x68] sm:$0xff]   ;;  %v756_v52 = vld [vmem:[#allocation5 + $0x70] sm:$0xff]  }
  0x3d   :  { %669 = vmatmul.mubr.msk.bf16.vlgmr.msra.gmra.mrb[0].mxu0 %vm67_vm1, %v60_v3  ;;  %v138_v41 = vrot.slane %v961_v35, %v137_v37  ;;  %v757_v53 = vld [vmem:[#allocation5 + $0x78] sm:$0xff]   ;;  %v758_v54 = vld [vmem:[#allocation5 + $0x80] sm:$0xff]   ;;  %p854_p13 = por %p853_p12, %p852_p11 }
  0x3e   :  { %708 = vmatprep.mubr.msk.bf16.mxu0 %vm883_vm0, %v882_v0  ;;  %675 = vmatpush3.bf16.msra.mxu1 %v744_v5 }
  0x3f   :  { %676 = vmatprep.subr.bf16.mxu1 %v882_v0  ;;  %693 = vmatpush3.bf16.msra.mxu0 %v751_v47  ;;  %p855_p0 = pnand %p854_p13, %p848_p10 }
  0x40   :  { %694 = vmatprep.subr.bf16.mxu0 %v882_v0 }
  0x42   :  { %677 = vmatpush3.bf16.msra.mxu1 %v745_v6 }
  0x43   :  { %678 = vmatprep.subr.bf16.mxu1 %v882_v0  ;;  %695 = vmatpush3.bf16.msra.mxu0 %v752_v48 }
  0x44   :  { %696 = vmatprep.subr.bf16.mxu0 %v882_v0 }
  0x46   :  { %679 = vmatpush3.bf16.msra.mxu1 %v746_v7 }
  0x47   :  { %680 = vmatprep.subr.bf16.mxu1 %v882_v0  ;;  %697 = vmatpush3.bf16.msra.mxu0 %v753_v49 }
  0x48   :  { %698 = vmatprep.subr.bf16.mxu0 %v882_v0 }
  0x4a   :  { %681 = vmatpush3.bf16.msra.mxu1 %v747_v8 }
  0x4b   :  { %682 = vmatprep.subr.bf16.mxu1 %v882_v0  ;;  %699 = vmatpush3.bf16.msra.mxu0 %v754_v50 }
  0x4c   :  { %700 = vmatprep.subr.bf16.mxu0 %v882_v0 }
  0x4e   :  { %683 = vmatpush3.bf16.msra.mxu1 %v748_v9 }
  0x4f   :  { %684 = vmatprep.subr.bf16.mxu1 %v882_v0  ;;  %701 = vmatpush3.bf16.msra.mxu0 %v755_v51 }
  0x50   :  { %702 = vmatprep.subr.bf16.mxu0 %v882_v0 }
  0x52   :  { %685 = vmatpush3.bf16.msra.mxu1 %v749_v10 }
  0x53   :  { %686 = vmatprep.subr.bf16.mxu1 %v882_v0  ;;  %703 = vmatpush3.bf16.msra.mxu0 %v756_v52 }
  0x54   :  { %704 = vmatprep.subr.bf16.mxu0 %v882_v0 }
  0x56   :  { %687 = vmatpush3.bf16.msra.mxu1 %v750_v11 }
  0x57   :  { %712 = vmatprep.subr.bf16.mxu1 %v882_v0  ;;  %705 = vmatpush3.bf16.msra.mxu0 %v757_v53 }
  0x58   :  { %706 = vmatprep.subr.bf16.mxu0 %v882_v0 }
  0x5b   :  { %707 = vmatpush3.bf16.msra.mxu0 %v758_v54 }
 0x110   :  { %v105_v12 = vpop.f32.mrb[0].mxu0 }
 0x111   :  { %v111_v13 = vrot.slane %v105_v12, 4  ;;  %v670_v14 = vpop.f32.mrb[1].mxu0 }
 0x112   :  { %v108_v15 = vpop.f32.mrb[2].mxu0  ;;  %v273_v14 = vsub.s32 5, %v959_v34 }
 0x113   :  { %v112_v16 = vadd.f32 %v111_v13, %v105_v12  ;;  %v671_v17 = vpop.f32.mrb[3].mxu0  ;;  %v268_v13 = vsub.s32 1, %v959_v34 }
 0x115   :  { %v113_v18 = vrot.slane %v112_v16, 2 }
 0x117   :  { %v114_v19 = vadd.f32 %v113_v18, %v112_v16  ;;  %v274_v18 = vrot.slane %v961_v35, %v273_v14 }
 0x119   :  { %v115_v20 = vrot.slane %v114_v19, 1 }
 0x11b   :  { %v116_v21 = vadd.f32 %v115_v20, %v114_v19 }
 0x11d   :  { %v117_v22 = vmul.f32 0.125, %v116_v21 }
 0x11f   :  { %v118_v23 = vsub.f32 %v105_v12, %v117_v22 }
 0x121   :  { %v119_v24 = vmul.f32 %v118_v23, %v118_v23 }
 0x123   :  { %v120_v25 = vrot.slane %v119_v24, 4 }
 0x125   :  { %v121_v26 = vadd.f32 %v120_v25, %v119_v24  ;;  %v759_v24 = vld [vmem:[#allocation5 + $0x88] sm:$0xff]   ;;  %v760_v25 = vld [vmem:[#allocation5 + $0x90] sm:$0xff]  }
 0x127   :  { %v122_v27 = vrot.slane %v121_v26, 2 }
 0x129   :  { %v123_v28 = vadd.f32 %v122_v27, %v121_v26  ;;  %v761_v26 = vld [vmem:[#allocation5 + $0x98] sm:$0xff]   ;;  %v762_v27 = vld [vmem:[#allocation5 + $0xa0] sm:$0xff]  }
 0x12b   :  { %v124_v29 = vrot.slane %v123_v28, 1 }
 0x12d   :  { %v125_v30 = vadd.f32 %v124_v29, %v123_v28  ;;  %v763_v28 = vld [vmem:[#allocation5 + $0xa8] sm:$0xff]   ;;  %v764_v29 = vld [vmem:[#allocation5 + $0xb0] sm:$0xff]  }
 0x12f   :  { %v126_v31 = vmul.f32 0.125, %v125_v30  ;;  %v765_v30 = vld [vmem:[#allocation5 + $0xb8] sm:$0xff]  }
 0x131   :  { %v127_v32 = vadd.f32 1e-05, %v126_v31  ;;  %v766_v31 = vld [vmem:[#allocation5 + $0xc0] sm:$0xff]  }
 0x133   :  { %767 = vrsqrt.f32 %v127_v32 }
 0x13d   :  { %v768_v38 = vpop.eup %767 }
 0x13e   :  { %v129_v39 = vmul.f32 %v768_v38, %v961_v35 }
 0x140   :  { %v133_v40 = vrot.slane %v129_v39, %v132_v36 }
 0x142   :  { %v134_v42 = vmul.f32 %v133_v40, %v118_v23 }
 0x144   :  { %v139_v43 = vadd.f32 %v138_v41, %v134_v42 }
 0x146   :  { %v140_v44 = vmul.f32 0.01, %v139_v43 }
 0x148   :  { %v141_v45 = vmax.f32 %v139_v43, %v140_v44 }
 0x14a   :  { %v158_v46 = vpack.c.bf16 %v141_v45, %v141_v45 }
 0x14c   :  { %689 = vmatmul.mubr.bf16.vlgmr.msra.gmra.mrb[0].mxu1 %v158_v46 }
 0x14d   :  { %728 = vmatprep.mubr.msk.bf16.mxu1 %vm883_vm0, %v882_v0  ;;  %713 = vmatpush3.bf16.msra.mxu1 %v759_v24 }
 0x14e   :  { %714 = vmatprep.subr.bf16.mxu1 %v882_v0 }
 0x151   :  { %715 = vmatpush3.bf16.msra.mxu1 %v760_v25 }
 0x152   :  { %716 = vmatprep.subr.bf16.mxu1 %v882_v0 }
 0x155   :  { %717 = vmatpush3.bf16.msra.mxu1 %v761_v26  ;;  %v540_v26 = vsub.s32 3, %v959_v34 }
 0x156   :  { %718 = vmatprep.subr.bf16.mxu1 %v882_v0 }
 0x159   :  { %719 = vmatpush3.bf16.msra.mxu1 %v762_v27  ;;  %v545_v27 = vsub.s32 7, %v959_v34 }
 0x15a   :  { %720 = vmatprep.subr.bf16.mxu1 %v882_v0 }
 0x15d   :  { %721 = vmatpush3.bf16.msra.mxu1 %v763_v28 }
 0x15e   :  { %722 = vmatprep.subr.bf16.mxu1 %v882_v0 }
 0x161   :  { %723 = vmatpush3.bf16.msra.mxu1 %v764_v29 }
 0x162   :  { %724 = vmatprep.subr.bf16.mxu1 %v882_v0 }
 0x165   :  { %725 = vmatpush3.bf16.msra.mxu1 %v765_v30 }
 0x166   :  { %726 = vmatprep.subr.bf16.mxu1 %v882_v0 }
 0x169   :  { %727 = vmatpush3.bf16.msra.mxu1 %v766_v31  ;;  %v546_v31 = vrot.slane %v961_v35, %v545_v27 }
 0x21f   :  { %v241_v55 = vpop.f32.mrb[0].mxu1 }
 0x220   :  { %v247_v56 = vrot.slane %v241_v55, 4  ;;  %v690_v57 = vpop.f32.mrb[1].mxu1 }
 0x221   :  { %v244_v58 = vpop.f32.mrb[2].mxu1  ;;  %v409_v57 = vsub.s32 6, %v959_v34 }
 0x222   :  { %v248_v59 = vadd.f32 %v247_v56, %v241_v55  ;;  %v691_v60 = vpop.f32.mrb[3].mxu1  ;;  %v404_v56 = vsub.s32 2, %v959_v34 }
 0x224   :  { %v249_v61 = vrot.slane %v248_v59, 2 }
 0x226   :  { %v250_v62 = vadd.f32 %v249_v61, %v248_v59  ;;  %v410_v61 = vrot.slane %v961_v35, %v409_v57 }
 0x228   :  { %v251_v63 = vrot.slane %v250_v62, 1 }
 0x22a   :  { %v252_v1 = vadd.f32 %v251_v63, %v250_v62 }
 0x22c   :  { %v253_v2 = vmul.f32 0.125, %v252_v1 }
 0x22e   :  { %v254_v3 = vsub.f32 %v241_v55, %v253_v2 }
 0x230   :  { %v255_v4 = vmul.f32 %v254_v3, %v254_v3 }
 0x232   :  { %v256_v5 = vrot.slane %v255_v4, 4 }
 0x234   :  { %v257_v6 = vadd.f32 %v256_v5, %v255_v4 }
 0x236   :  { %v258_v7 = vrot.slane %v257_v6, 2 }
 0x238   :  { %v259_v8 = vadd.f32 %v258_v7, %v257_v6 }
 0x23a   :  { %v260_v9 = vrot.slane %v259_v8, 1 }
 0x23c   :  { %v261_v10 = vadd.f32 %v260_v9, %v259_v8 }
 0x23e   :  { %v262_v11 = vmul.f32 0.125, %v261_v10 }
 0x240   :  { %v263_v12 = vadd.f32 1e-05, %v262_v11 }
 0x242   :  { %769 = vrsqrt.f32 %v263_v12 }
 0x24c   :  { %v770_v15 = vpop.eup %769 }
 0x24d   :  { %v265_v16 = vmul.f32 %v770_v15, %v961_v35 }
 0x24f   :  { %v269_v17 = vrot.slane %v265_v16, %v268_v13 }
 0x251   :  { %v270_v19 = vmul.f32 %v269_v17, %v254_v3 }
 0x253   :  { %v275_v20 = vadd.f32 %v274_v18, %v270_v19 }
 0x255   :  { %v276_v21 = vmul.f32 0.01, %v275_v20 }
 0x257   :  { %v277_v22 = vmax.f32 %v275_v20, %v276_v21 }
 0x259   :  { %v294_v23 = vpack.c.bf16 %v277_v22, %v277_v22 }
 0x25b   :  { %709 = vmatmul.mubr.bf16.vlgmr.msra.gmra.mrb[4].mxu0 %v294_v23 }
 0x32e   :  { %v377_v32 = vpop.f32.mrb[4].mxu0 }
 0x32f   :  { %v383_v37 = vrot.slane %v377_v32, 4  ;;  %v710_v38 = vpop.f32.mrb[5].mxu0 }
 0x330   :  { %v380_v39 = vpop.f32.mrb[6].mxu0 }
 0x331   :  { %v384_v40 = vadd.f32 %v383_v37, %v377_v32  ;;  %v711_v41 = vpop.f32.mrb[7].mxu0  ;;  %v57_v37 = vld [vmem:[#allocation7 + $0x8] sm:$0x7] }
 0x333   :  { %v385_v42 = vrot.slane %v384_v40, 2 }
 0x335   :  { %v386_v43 = vadd.f32 %v385_v42, %v384_v40  ;;  %v553_v40 = vrot.slane %v57_v37, %v132_v36 }
 0x337   :  { %v387_v44 = vrot.slane %v386_v43, 1 }
 0x339   :  { %v388_v45 = vadd.f32 %v387_v44, %v386_v43  ;;  %v560_v43 = vrot.slane %v57_v37, %v268_v13 }
 0x33b   :  { %v389_v46 = vmul.f32 0.125, %v388_v45  ;;  %v565_v45 = vand.u32 127, %v130_v33 }
 0x33d   :  { %v390_v47 = vsub.f32 %v377_v32, %v389_v46  ;;  %vm566_vm2 = vcmp.eq.s32.totalorder %v565_v45, 0  ;;  %vm567_vm3 = vcmp.eq.s32.totalorder %v565_v45, 1 }
 0x33f   :  { %v391_v48 = vmul.f32 %v390_v47, %v390_v47 }
 0x341   :  { %v392_v49 = vrot.slane %v391_v48, 4 }
 0x343   :  { %v393_v50 = vadd.f32 %v392_v49, %v391_v48 }
 0x345   :  { %v394_v51 = vrot.slane %v393_v50, 2 }
 0x347   :  { %v395_v52 = vadd.f32 %v394_v51, %v393_v50 }
 0x349   :  { %v396_v0 = vrot.slane %v395_v52, 1 }
 0x34b   :  { %v397_v53 = vadd.f32 %v396_v0, %v395_v52 }
 0x34d   :  { %v398_v54 = vmul.f32 0.125, %v397_v53 }
 0x34f   :  { %v399_v55 = vadd.f32 1e-05, %v398_v54 }
 0x351   :  { %771 = vrsqrt.f32 %v399_v55 }
 0x35b   :  { %v772_v58 = vpop.eup %771 }
 0x35c   :  { %v401_v59 = vmul.f32 %v772_v58, %v961_v35 }
 0x35e   :  { %v405_v60 = vrot.slane %v401_v59, %v404_v56 }
 0x360   :  { %v406_v62 = vmul.f32 %v405_v60, %v390_v47 }
 0x362   :  { %v411_v63 = vadd.f32 %v410_v61, %v406_v62 }
 0x364   :  { %v412_v1 = vmul.f32 0.01, %v411_v63 }
 0x366   :  { %v413_v2 = vmax.f32 %v411_v63, %v412_v1 }
 0x368   :  { %v430_v3 = vpack.c.bf16 %v413_v2, %v413_v2 }
 0x36a   :  { %729 = vmatmul.mubr.bf16.vlgmr.msra.gmra.mrb[4].mxu1 %v430_v3 }
 0x43d   :  { %v513_v4 = vpop.f32.mrb[4].mxu1 }
 0x43e   :  { %v519_v5 = vrot.slane %v513_v4, 4  ;;  %v730_v6 = vpop.f32.mrb[5].mxu1 }
 0x43f   :  { %v516_v7 = vpop.f32.mrb[6].mxu1 }
 0x440   :  { %v520_v8 = vadd.f32 %v519_v5, %v513_v4  ;;  %v731_v9 = vpop.f32.mrb[7].mxu1 }
 0x442   :  { %v521_v10 = vrot.slane %v520_v8, 2 }
 0x444   :  { %v522_v11 = vadd.f32 %v521_v10, %v520_v8 }
 0x446   :  { %v523_v12 = vrot.slane %v522_v11, 1 }
 0x448   :  { %v524_v14 = vadd.f32 %v523_v12, %v522_v11 }
 0x44a   :  { %v525_v15 = vmul.f32 0.125, %v524_v14 }
 0x44c   :  { %v526_v16 = vsub.f32 %v513_v4, %v525_v15 }
 0x44e   :  { %v527_v17 = vmul.f32 %v526_v16, %v526_v16 }
 0x450   :  { %v528_v18 = vrot.slane %v527_v17, 4 }
 0x452   :  { %v529_v19 = vadd.f32 %v528_v18, %v527_v17 }
 0x454   :  { %v530_v20 = vrot.slane %v529_v19, 2 }
 0x456   :  { %v531_v21 = vadd.f32 %v530_v20, %v529_v19 }
 0x458   :  { %v532_v22 = vrot.slane %v531_v21, 1 }
 0x45a   :  { %v533_v23 = vadd.f32 %v532_v22, %v531_v21 }
 0x45c   :  { %v534_v24 = vmul.f32 0.125, %v533_v23 }
 0x45e   :  { %v535_v25 = vadd.f32 1e-05, %v534_v24 }
 0x460   :  { %773 = vrsqrt.f32 %v535_v25 }
 0x46a   :  { %v774_v28 = vpop.eup %773 }
 0x46b   :  { %v537_v29 = vmul.f32 %v774_v28, %v961_v35  ;;  %v574_v35 = vrot.slane %v57_v37, %v404_v56 }
 0x46d   :  { %v541_v30 = vrot.slane %v537_v29, %v540_v26 }
 0x46f   :  { %v542_v32 = vmul.f32 %v541_v30, %v526_v16 }
 0x471   :  { %v547_v38 = vadd.f32 %v546_v31, %v542_v32 }
 0x473   :  { %v548_v39 = vmul.f32 0.01, %v547_v38 }
 0x475   :  { %v549_v41 = vmax.f32 %v547_v38, %v548_v39 }
 0x477   :  { %v554_v42 = vmul.f32 %v553_v40, %v549_v41  ;;  %v561_v44 = vmul.f32 %v560_v43, %v549_v41 }
 0x479   :  { %555 = vadd.xlane.f32.xlu0 %v554_v42 }
 0x47d   :  { %562 = vadd.xlane.f32.xlu0 %v561_v44 }
 0x506   :  { %v556_v46 = vpop.xlane.xlu0 %555 }
 0x507   :  { %v568_v48 = vsel %vm566_vm2, %v556_v46, 0.0 }
 0x50a   :  { %v563_v47 = vpop.xlane.xlu0 %562 }
 0x50b   :  { %v569_v49 = vsel %vm567_vm3, %v563_v47, 0.0 }
 0x50c   :  { %v570_v50 = vadd.f32 %v569_v49, %v568_v48 }
 0x50e   :  { %v575_v36 = vadd.f32 %v574_v35, %v570_v50 }
 0x510   :  { %v578_v51 = vmin.f32 %v575_v36, 20.0  ;;  %vm579_vm5 = vcmp.gt.f32.partialorder %v575_v36, 20.0 }
 0x512   :  { %v580_v52 = vmul.f32 1.442695, %v578_v51 }
 0x514   :  { %775 = vpow2.f32 %v580_v52 }
 0x51e   :  { %v776_v34 = vpop.eup %775 }
 0x51f   :  { %v582_v13 = vadd.f32 1.0, %v776_v34  ;;  %v585_v0 = vmul.f32 -0.5, %v776_v34  ;;  %v588_v33 = vand.u32 2147483647, %v776_v34 }
 0x521   :  { %777 = vlog2.f32 %v582_v13  ;;  %v586_v53 = vadd.f32 1.0, %v585_v0  ;;  %vm589_vm4 = vcmp.lt.f32.partialorder %v588_v33, 0.0004427343 }
 0x522   :  { %779 = vtanh.f32 %v575_v36 }
 0x523   :  { %v587_v57 = vmul.f32 %v776_v34, %v586_v53 }
 0x52b   :  { %v778_v54 = vpop.eup %777 }
 0x52c   :  { %v584_v55 = vmul.f32 0.6931472, %v778_v54  ;;  %v780_v56 = vpop.eup %779 }
 0x52d   :  { %v577_v60 = vmul.f32 1.5, %v780_v56 }
 0x52e   :  { %v590_v58 = vsel %vm589_vm4, %v587_v57, %v584_v55 }
 0x52f   :  { %v591_v59 = vsel %vm579_vm5, %v575_v36, %v590_v58 }
 0x530   :  { %v592_v61 = vmul.f32 0.5, %v591_v59 }
 0x532   :  { %v593_v62 = vsel %vm566_vm2, %v577_v60, %v592_v61 }
 0x533   :  { %594 = vst [vmem:[#allocation8] sm:$0xff] %v593_v62 }
 0x534   :  { %858 = shalt.err (!%p855_p0)
}
 0x535   :  { %s859_s27 = scalar_lea.hbm %s1021_s3, 128 }
 0x536   :  { %p860_p1 = scmp.ne.s32.totalorder %s1021_s3, %s859_s27  ;;  %p863_p2 = scmp.lt.u32.totalorder %s859_s27, %s1021_s3 }
 0x538   :  { %p865_p3 = pnand %p863_p2, %p860_p1 }
 0x53a   :  { %868 = shalt.err (!%p865_p3)
}
 0x53b   :  { %604 = dma.vmem_to_hbm [thread:$0]  %s602_s23, 128, %s1021_s3, [#allocation4]  }
 0x53c   :  { %873 = dma.done.wait [#allocation4], 128  }
 0x53d   :  { %874 = vsyncadd [#allocation4], 4294967168 }
 0x53e   :  { %608 = vsyncpa [#allocation3], 1 }
 0x53f   :  { %609 = vsyncpa [#allocation6], 1 }
 0x540   :  { %610 = vsyncpa [#allocation4], 1 }

</bundles_post_ra>
